<compile_context>
chip_gen: v7x
topology: tpu7x:2x2x1
jax: 0.10.0
libtpu: 0.0.40
codegen_flags: <defaults>
</compile_context>

<pallas_src>
import math

import jax
import jax.numpy as jnp
from jax.experimental import pallas as pl
from jax.experimental.pallas import tpu as pltpu

EPS = 1e-5  # PyTorch default eps for F.layer_norm

_LANES = 128
_SUBLANES = 8


def _round_up(a, m):
    return -(-a // m) * m


def _cdiv(a, b):
    return -(-a // b)


def _vmem_capacity_bytes():
    """Per-core VMEM of the local TPU; conservative fallback if unavailable."""
    cap = None
    try:
        info = pltpu.get_tpu_info()
        cap = getattr(info, "vmem_capacity_bytes", None)
    except Exception:
        cap = None
    if not cap:
        cap = 64 * 1024 * 1024  # smallest of v5e/v6e/v7x per-TensorCore VMEM
    # Defensive clamp in case the query reports per-chip instead of per-core.
    return int(min(max(int(cap), 16 * 1024 * 1024), 128 * 1024 * 1024))


def _make_kernel_k1(d):
    """LayerNorm over a lane-dense (tile_rows, d) tile (d multiple-of-128-ish)."""
    inv_d = 1.0 / float(d)

    def kernel(x_ref, w_ref, b_ref, o_ref):
        x = x_ref[...].astype(jnp.float32)                   # (tm, d)
        mean = jnp.sum(x, axis=-1, keepdims=True) * inv_d
        xc = x - mean
        var = jnp.sum(xc * xc, axis=-1, keepdims=True) * inv_d
        inv = jax.lax.rsqrt(var + EPS)
        y = xc * inv
        y = y * w_ref[...].astype(jnp.float32) + b_ref[...].astype(jnp.float32)
        o_ref[...] = y.astype(o_ref.dtype)

    return kernel


def _make_kernel_packed(k, d):
    """LayerNorm over a (tile_rows, k*d) tile where each packed row holds k rows.

    Per-group reductions / broadcasts go through small MXU matmuls against
    the resident selector matrices g_ref (p, k) and gt_ref (k, p).
    """
    inv_d = 1.0 / float(d)

    def kernel(x_ref, w_ref, b_ref, g_ref, gt_ref, o_ref):
        x = x_ref[...].astype(jnp.float32)                   # (tm, p)
        g_mat = g_ref[...]                                    # (p, k), resident
        g_mat_t = gt_ref[...]                                 # (k, p), resident
        # Centered (two-pass) statistics; MXU idle otherwise, HIGHEST is free.
        s1 = jnp.dot(x, g_mat, preferred_element_type=jnp.float32,
                     precision=jax.lax.Precision.HIGHEST)     # (tm, k)
        mean = s1 * inv_d
        mean_b = jnp.dot(mean, g_mat_t, preferred_element_type=jnp.float32,
                         precision=jax.lax.Precision.HIGHEST)  # (tm, p)
        xc = x - mean_b
        s2 = jnp.dot(xc * xc, g_mat, preferred_element_type=jnp.float32,
                     precision=jax.lax.Precision.HIGHEST)     # (tm, k)
        inv = jax.lax.rsqrt(s2 * inv_d + EPS)
        inv_b = jnp.dot(inv, g_mat_t, preferred_element_type=jnp.float32,
                        precision=jax.lax.Precision.HIGHEST)  # (tm, p)
        y = xc * inv_b
        y = y * w_ref[...].astype(jnp.float32) + b_ref[...].astype(jnp.float32)
        o_ref[...] = y.astype(o_ref.dtype)

    return kernel


def layer_norm_pallas(x, weight, bias):
    """LayerNorm over the last dim of x (any rank >= 1), matching F.layer_norm."""
    orig_shape = x.shape
    d = int(orig_shape[-1])
    rows = int(math.prod(orig_shape[:-1])) if len(orig_shape) > 1 else 1
    x2 = x.reshape(rows, d)

    # --- lane-dense packing: k rows per packed row, width p = k*d ----------
    gcd = math.gcd(d, _LANES)
    k = _LANES // gcd
    if k <= 1 or k * d > 4 * _LANES:   # only pack when p stays <= 512 lanes
        k = 1
    p = k * d

    # Pad rows only up to a multiple of k (at most k-1 tiny rows; usually a
    # no-op).  Ragged last grid block is handled by Pallas (masked writes).
    rows_pad = _round_up(rows, k)
    if rows_pad != rows:
        pad = jnp.zeros((rows_pad - rows, d), dtype=x2.dtype)
        x2 = jnp.concatenate([x2, pad], axis=0)
    rows_p = rows_pad // k
    xp = x2.reshape(rows_p, p)          # contiguous data -> pure reshape

    # --- generation-aware tiling --------------------------------------------
    vmem_cap = _vmem_capacity_bytes()
    small_vmem = vmem_cap <= 64 * 1024 * 1024           # v7x-like (64 MiB/TC)
    target_block_bytes = (4 if small_vmem else 8) * 1024 * 1024
    min_steps = 8 if small_vmem else 4                   # keep pipeline busy
    vmem_limit = (48 * 1024 * 1024 if small_vmem
                  else min(int(vmem_cap * 0.85), 110 * 1024 * 1024))

    x_item = jnp.dtype(x.dtype).itemsize
    # Footprint per packed row: double-buffered in + out, ~4 f32 temporaries.
    per_row_bytes = p * (2 * x_item + 2 * x_item + 4 * 4)
    tile_cap = max(_SUBLANES, int(vmem_cap * 0.7) // per_row_bytes)
    tile_rows = max(_SUBLANES, min(target_block_bytes // (p * x_item), tile_cap))
    tile_rows = (tile_rows // _SUBLANES) * _SUBLANES

    # For small inputs, shrink the tile so there are >= min_steps grid steps
    # (DMA/compute/writeback overlap; megacore split on v7x), never below 8 rows.
    if _cdiv(rows_p, tile_rows) < min_steps:
        shrunk = _round_up(_cdiv(rows_p, min_steps), _SUBLANES)
        tile_rows = max(_SUBLANES, min(tile_rows, shrunk))

    grid = (_cdiv(rows_p, tile_rows),)

    # --- resident parameters (and selector matrices when packed) ------------
    w_row = weight.reshape(1, d)
    b_row = bias.reshape(1, d)
    if k > 1:
        w_row = jnp.tile(w_row, (1, k))
        b_row = jnp.tile(b_row, (1, k))

    row_spec = pl.BlockSpec((tile_rows, p), lambda i: (i, 0))

    def resident(shape):
        return pl.BlockSpec(shape, lambda i: (0, 0))

    if k > 1:
        lane = jax.lax.broadcasted_iota(jnp.int32, (p, k), 0)
        grp = jax.lax.broadcasted_iota(jnp.int32, (p, k), 1)
        g_mat = (lane // d == grp).astype(jnp.float32)        # (p, k)
        g_mat_t = g_mat.T                                      # (k, p)
        kernel = _make_kernel_packed(k, d)
        in_specs = [row_spec, resident((1, p)), resident((1, p)),
                    resident((p, k)), resident((k, p))]
        operands = (xp, w_row, b_row, g_mat, g_mat_t)
    else:
        kernel = _make_kernel_k1(d)
        in_specs = [row_spec, resident((1, p)), resident((1, p))]
        operands = (xp, w_row, b_row)

    out = pl.pallas_call(
        kernel,
        out_shape=jax.ShapeDtypeStruct((rows_p, p), x.dtype),
        grid_spec=pltpu.PrefetchScalarGridSpec(
            num_scalar_prefetch=0,
            grid=grid,
            in_specs=in_specs,
            out_specs=row_spec,
        ),
        compiler_params=pltpu.CompilerParams(
            dimension_semantics=("parallel",),
            vmem_limit_bytes=vmem_limit,
        ),
    )(*operands)

    out = out.reshape(rows_pad, d)
    if rows_pad != rows:
        out = out[:rows]
    return out.reshape(orig_shape)


if __name__ == "__main__":
    # config.embedding_dim
    embedding_dim = 32
    batch, seq = 2, 8

    key = jax.random.PRNGKey(0)
    kx, _, _ = jax.random.split(key, 3)
    x = jax.random.normal(kx, (batch, seq, embedding_dim), dtype=jnp.float32)

    # nn.Parameter init from the module: weight = ones, bias = zeros
    weight = jnp.ones((embedding_dim,), dtype=jnp.float32)
    bias = jnp.zeros((embedding_dim,), dtype=jnp.float32)

    y = layer_norm_pallas(x, weight, bias)
    jax.block_until_ready(y)

    # quick sanity check vs pure-JAX reference
    mean = jnp.mean(x, axis=-1, keepdims=True)
    var = jnp.mean((x - mean) ** 2, axis=-1, keepdims=True)
    ref = (x - mean) * jax.lax.rsqrt(var + EPS) * weight + bias
    assert y.shape == x.shape
    assert jnp.allclose(y, ref, atol=1e-4, rtol=1e-4), "mismatch vs reference"

    print("KERNEL_OK")
</pallas_src>

<mosaic_0001>
module attributes {stable_mosaic.version = 11 : i64} {
  func.func @kernel(%arg0: i32, %arg1: memref<8x128xf32, #tpu.memory_space<vmem>>, %arg2: memref<1x128xf32, #tpu.memory_space<vmem>>, %arg3: memref<1x128xf32, #tpu.memory_space<vmem>>, %arg4: memref<128x4xf32, #tpu.memory_space<vmem>>, %arg5: memref<4x128xf32, #tpu.memory_space<vmem>>, %arg6: memref<8x128xf32, #tpu.memory_space<vmem>>) attributes {dimension_semantics = [#tpu.dimension_semantics<parallel>], iteration_bounds = array<i64: 1>, scalar_prefetch = 0 : i64, scratch_operands = 0 : i64, tpu.core_type = #tpu.core_type<tc>, window_params = [{transform_indices = @transform_0, window_bounds = array<i64: 8, 128>}, {pipeline_mode = #tpu.pipeline_mode<synchronous>, transform_indices = @transform_1, window_bounds = array<i64: 1, 128>}, {pipeline_mode = #tpu.pipeline_mode<synchronous>, transform_indices = @transform_2, window_bounds = array<i64: 1, 128>}, {pipeline_mode = #tpu.pipeline_mode<synchronous>, transform_indices = @transform_3, window_bounds = array<i64: 128, 4>}, {pipeline_mode = #tpu.pipeline_mode<synchronous>, transform_indices = @transform_4, window_bounds = array<i64: 4, 128>}, {transform_indices = @transform_5, window_bounds = array<i64: 8, 128>}]} {
    %c0 = arith.constant 0 : index
    %c0_0 = arith.constant 0 : index
    %0 = vector.load %arg1[%c0, %c0_0] : memref<8x128xf32, #tpu.memory_space<vmem>>, vector<8x128xf32>
    %c0_1 = arith.constant 0 : index
    %c0_2 = arith.constant 0 : index
    %1 = vector.load %arg4[%c0_1, %c0_2] : memref<128x4xf32, #tpu.memory_space<vmem>>, vector<128x4xf32>
    %c0_3 = arith.constant 0 : index
    %c0_4 = arith.constant 0 : index
    %2 = vector.load %arg5[%c0_3, %c0_4] : memref<4x128xf32, #tpu.memory_space<vmem>>, vector<4x128xf32>
    %cst = arith.constant dense<0.000000e+00> : vector<8x4xf32>
    %3 = tpu.matmul %0, %1, %cst {dimension_numbers = #tpu.dot_dimension_numbers<[1], [0], [0], [1], [0, 0, 1, 1], [], []>, precision = #tpu.contract_precision<fp32>} : vector<8x128xf32>, vector<128x4xf32>, vector<8x4xf32> -> vector<8x4xf32>
    %cst_5 = arith.constant 3.125000e-02 : f32
    %4 = vector.broadcast %cst_5 : f32 to vector<8x4xf32>
    %5 = arith.mulf %3, %4 : vector<8x4xf32>
    %cst_6 = arith.constant dense<0.000000e+00> : vector<8x128xf32>
    %6 = tpu.matmul %5, %2, %cst_6 {dimension_numbers = #tpu.dot_dimension_numbers<[1], [0], [0], [1], [0, 0, 1, 1], [], []>, precision = #tpu.contract_precision<fp32>} : vector<8x4xf32>, vector<4x128xf32>, vector<8x128xf32> -> vector<8x128xf32>
    %7 = arith.subf %0, %6 : vector<8x128xf32>
    %8 = arith.mulf %7, %7 : vector<8x128xf32>
    %cst_7 = arith.constant dense<0.000000e+00> : vector<8x4xf32>
    %9 = tpu.matmul %8, %1, %cst_7 {dimension_numbers = #tpu.dot_dimension_numbers<[1], [0], [0], [1], [0, 0, 1, 1], [], []>, precision = #tpu.contract_precision<fp32>} : vector<8x128xf32>, vector<128x4xf32>, vector<8x4xf32> -> vector<8x4xf32>
    %cst_8 = arith.constant 3.125000e-02 : f32
    %10 = vector.broadcast %cst_8 : f32 to vector<8x4xf32>
    %11 = arith.mulf %9, %10 : vector<8x4xf32>
    %cst_9 = arith.constant 9.99999974E-6 : f32
    %12 = vector.broadcast %cst_9 : f32 to vector<8x4xf32>
    %13 = arith.addf %11, %12 : vector<8x4xf32>
    %14 = math.rsqrt %13 : vector<8x4xf32>
    %cst_10 = arith.constant dense<0.000000e+00> : vector<8x128xf32>
    %15 = tpu.matmul %14, %2, %cst_10 {dimension_numbers = #tpu.dot_dimension_numbers<[1], [0], [0], [1], [0, 0, 1, 1], [], []>, precision = #tpu.contract_precision<fp32>} : vector<8x4xf32>, vector<4x128xf32>, vector<8x128xf32> -> vector<8x128xf32>
    %16 = arith.mulf %7, %15 : vector<8x128xf32>
    %c0_11 = arith.constant 0 : index
    %c0_12 = arith.constant 0 : index
    %17 = vector.load %arg2[%c0_11, %c0_12] : memref<1x128xf32, #tpu.memory_space<vmem>>, vector<1x128xf32>
    %18 = vector.broadcast %17 : vector<1x128xf32> to vector<8x128xf32>
    %19 = arith.mulf %16, %18 : vector<8x128xf32>
    %c0_13 = arith.constant 0 : index
    %c0_14 = arith.constant 0 : index
    %20 = vector.load %arg3[%c0_13, %c0_14] : memref<1x128xf32, #tpu.memory_space<vmem>>, vector<1x128xf32>
    %21 = vector.broadcast %20 : vector<1x128xf32> to vector<8x128xf32>
    %22 = arith.addf %19, %21 : vector<8x128xf32>
    %c0_15 = arith.constant 0 : index
    %c0_16 = arith.constant 0 : index
    %23 = vector.load %arg6[%c0_15, %c0_16] : memref<8x128xf32, #tpu.memory_space<vmem>>, vector<8x128xf32>
    tpu.vector_store %arg6[%c0_15, %c0_16], %22 {strides = array<i32>} : memref<8x128xf32, #tpu.memory_space<vmem>>, vector<8x128xf32>,
    return
  }
  func.func @transform_0(%arg0: i32) -> (i32, i32) {
    %c0_i32 = arith.constant 0 : i32
    %c0_i32_0 = arith.constant 0 : i32
    return %arg0, %c0_i32 : i32, i32
  }
  func.func @transform_1(%arg0: i32) -> (i32, i32) {
    %c0_i32 = arith.constant 0 : i32
    %c0_i32_0 = arith.constant 0 : i32
    %c0_i32_1 = arith.constant 0 : i32
    return %c0_i32, %c0_i32_0 : i32, i32
  }
  func.func @transform_2(%arg0: i32) -> (i32, i32) {
    %c0_i32 = arith.constant 0 : i32
    %c0_i32_0 = arith.constant 0 : i32
    %c0_i32_1 = arith.constant 0 : i32
    return %c0_i32, %c0_i32_0 : i32, i32
  }
  func.func @transform_3(%arg0: i32) -> (i32, i32) {
    %c0_i32 = arith.constant 0 : i32
    %c0_i32_0 = arith.constant 0 : i32
    %c0_i32_1 = arith.constant 0 : i32
    return %c0_i32, %c0_i32_0 : i32, i32
  }
  func.func @transform_4(%arg0: i32) -> (i32, i32) {
    %c0_i32 = arith.constant 0 : i32
    %c0_i32_0 = arith.constant 0 : i32
    %c0_i32_1 = arith.constant 0 : i32
    return %c0_i32, %c0_i32_0 : i32, i32
  }
  func.func @transform_5(%arg0: i32) -> (i32, i32) {
    %c0_i32 = arith.constant 0 : i32
    %c0_i32_0 = arith.constant 0 : i32
    return %arg0, %c0_i32 : i32, i32
  }
}

</mosaic_0001>

<bundles_post_ra>
// kernel: tpu_custom_call.1
= control target key start
LH: loop header
LB: loop body
LE: loop exit
PB: predicated region body
PF: predicated region fallthrough
CT: control target
= control target key end

     0   :  { %10 = vsyncpa [#allocation3], 0  ;;  %v3334_v2 = vmov 0.0|0.0   ;;  %vm3335_vm0 = vmmov 0   ;;  %v3336_v11 = vmov 0.0   ;;  %vm685_vm1 = vcmask 1043456   ;;  %s3895_s0 = inlined_call_operand.vmem [shape: f32[4,128], index: 0, kind: input, shape index: {}]   ;;  %s3896_s1 = inlined_call_operand.vmem [shape: f32[1,128], index: 1, kind: input, shape index: {}]   ;;  %s3897_s2 = inlined_call_operand.vmem [shape: f32[1,128], index: 2, kind: input, shape index: {}]   ;;  %s3898_s3 = inlined_call_operand.vmem [shape: f32[128,4], index: 3, kind: input, shape index: {}]   ;;  %s3899_s4 = inlined_call_operand.vmem [shape: f32[4,128], index: 4, kind: input, shape index: {}]   ;;  %s3900_s5 = inlined_call_operand.hbm [shape: f32[4,128], index: 5, kind: output, shape index: {}]  }
   0x1   :  { %v22_v0 = vld [vmem:[%s3898_s3] sm:$0xff]  ;;  %v23_v1 = vld [vmem:[%s3898_s3 + $0x8] sm:$0xff]  ;;  %2974 = vmatprep.subr.bf16.mxu0 %v3334_v2  ;;  %v24_v5 = vld [vmem:[%s3898_s3 + $0x10] sm:$0xff]  ;;  %2526 = vmatprep.mubr.msk.f32.mxu0 %vm3335_vm0, %v3336_v11  ;;  %vm681_vm2 = vcmask 31744  }
   0x2   :  { %v40_v3 = vand.u32 4294901760, %v22_v0  ;;  %v43_v4 = vand.u32 4294901760, %v23_v1  ;;  %v25_v6 = vld [vmem:[%s3898_s3 + $0x18] sm:$0xff]  ;;  %v46_v7 = vand.u32 4294901760, %v24_v5  ;;  %v26_v9 = vld [vmem:[%s3898_s3 + $0x20] sm:$0xff]  ;;  %v27_v10 = vld [vmem:[%s3898_s3 + $0x28] sm:$0xff]  ;;  %2704 = vmatprep.subr.mxu1 %v3336_v11  ;;  %2706 = vmatprep.mubr.msk.f32.mxu1 %vm3335_vm0, %v3336_v11 }
   0x3   :  { %v49_v8 = vand.u32 4294901760, %v25_v6  ;;  %v52_v14 = vand.u32 4294901760, %v26_v9  ;;  %v55_v15 = vand.u32 4294901760, %v27_v10  ;;  %v28_v16 = vld [vmem:[%s3898_s3 + $0x30] sm:$0xff]  ;;  %v29_v17 = vld [vmem:[%s3898_s3 + $0x38] sm:$0xff]  ;;  %v30_v21 = vld [vmem:[%s3898_s3 + $0x40] sm:$0xff] }
   0x4   :  { %v3392_v12 = vpack.c.bf16 %v43_v4, %v40_v3  ;;  %v58_v19 = vand.u32 4294901760, %v28_v16  ;;  %v61_v20 = vand.u32 4294901760, %v29_v17  ;;  %v31_v22 = vld [vmem:[%s3898_s3 + $0x48] sm:$0xff]  ;;  %v3419_v23 = vld [vmem:[%s3895_s0] sm:$0xff]  ;;  %v32_v24 = vld [vmem:[%s3898_s3 + $0x50] sm:$0xff]  ;;  %v64_v25 = vand.u32 4294901760, %v30_v21 }
   0x5   :  { %v3397_v13 = vpack.c.bf16 %v49_v8, %v46_v7  ;;  %v3407_v18 = vpack.c.bf16 %v55_v15, %v52_v14  ;;  %v67_v26 = vand.u32 4294901760, %v31_v22  ;;  %v33_v27 = vld [vmem:[%s3898_s3 + $0x58] sm:$0xff]  ;;  %v34_v28 = vld [vmem:[%s3898_s3 + $0x60] sm:$0xff]  ;;  %v35_v29 = vld [vmem:[%s3898_s3 + $0x68] sm:$0xff]  ;;  %v3443_v33 = vand.u32 4294901760, %v3419_v23 }
   0x6   :  { %2976 = vmatpush3.bf16.msra.mxu0 %v3392_v12  ;;  %v3434_v30 = vpack.c.bf16 %v61_v20, %v58_v19  ;;  %v36_v31 = vld [vmem:[%s3898_s3 + $0x70] sm:$0xff]  ;;  %v37_v32 = vld [vmem:[%s3898_s3 + $0x78] sm:$0xff]  ;;  %v3445_v34 = vsub.f32 %v22_v0, %v40_v3  ;;  %v3447_v35 = vsub.f32 %v23_v1, %v43_v4  ;;  %v70_v36 = vand.u32 4294901760, %v32_v24 }
   0x7   :  { %2977 = vmatprep.subr.bf16.mxu0 %v3334_v2  ;;  %v73_v37 = vand.u32 4294901760, %v33_v27  ;;  %v76_v38 = vand.u32 4294901760, %v34_v28  ;;  %v79_v39 = vand.u32 4294901760, %v35_v29  ;;  %v82_v40 = vand.u32 4294901760, %v36_v31 }
   0x8   :  { %v85_v41 = vand.u32 4294901760, %v37_v32  ;;  %v3450_v42 = vsub.f32 %v24_v5, %v46_v7  ;;  %v3452_v43 = vsub.f32 %v25_v6, %v49_v8  ;;  %v3455_v44 = vpack.c.bf16 %v67_v26, %v64_v25 }
   0x9   :  { %v3459_v45 = vsub.f32 %v3419_v23, %v3443_v33  ;;  %v133_v46 = vand.u32 4294901760, %v3445_v34  ;;  %v140_v47 = vand.u32 4294901760, %v3447_v35  ;;  %v3464_v48 = vsub.f32 %v26_v9, %v52_v14 }
   0xa   :  { %2979 = vmatpush3.bf16.msra.mxu0 %v3397_v13  ;;  %v3466_v49 = vpack.c.bf16 %v73_v37, %v70_v36  ;;  %v3468_v50 = vpack.c.bf16 %v79_v39, %v76_v38  ;;  %v3470_v51 = vpack.c.bf16 %v85_v41, %v82_v40  ;;  %v147_v52 = vand.u32 4294901760, %v3450_v42 }
   0xb   :  { %2980 = vmatprep.subr.bf16.mxu0 %v3334_v2  ;;  %v154_v53 = vand.u32 4294901760, %v3452_v43  ;;  %v3474_v54 = vsub.f32 %v27_v10, %v55_v15  ;;  %v122_v55 = vand.u32 4294901760, %v3459_v45  ;;  %v134_v56 = vsub.f32 %v3445_v34, %v133_v46 }
   0xc   :  { %v141_v57 = vsub.f32 %v3447_v35, %v140_v47  ;;  %v3480_v58 = vsub.f32 %v28_v16, %v58_v19  ;;  %v161_v59 = vand.u32 4294901760, %v3464_v48  ;;  %v3484_v60 = vsub.f32 %v29_v17, %v61_v20 }
   0xd   :  { %v3486_v61 = vsub.f32 %v30_v21, %v64_v25  ;;  %v3488_v62 = vsub.f32 %v31_v22, %v67_v26  ;;  %v3490_v63 = vsub.f32 %v32_v24, %v70_v36  ;;  %v3492_v0 = vsub.f32 %v33_v27, %v73_v37 }
   0xe   :  { %2982 = vmatpush3.bf16.msra.mxu0 %v3407_v18  ;;  %v3494_v1 = vsub.f32 %v34_v28, %v76_v38  ;;  %v3496_v3 = vsub.f32 %v35_v29, %v79_v39  ;;  %v148_v4 = vsub.f32 %v3450_v42, %v147_v52  ;;  %v155_v5 = vsub.f32 %v3452_v43, %v154_v53 }
   0xf   :  { %2983 = vmatprep.subr.bf16.mxu0 %v3334_v2  ;;  %v3500_v6 = vsub.f32 %v36_v31, %v82_v40  ;;  %v3502_v7 = vsub.f32 %v37_v32, %v85_v41  ;;  %v123_v8 = vsub.f32 %v3459_v45, %v122_v55  ;;  %v135_v9 = vand.u32 4294901760, %v134_v56 }
  0x10   :  { %v168_v10 = vand.u32 4294901760, %v3474_v54  ;;  %v175_v14 = vand.u32 4294901760, %v3480_v58  ;;  %v142_v15 = vand.u32 4294901760, %v141_v57  ;;  %v182_v16 = vand.u32 4294901760, %v3484_v60 }
  0x11   :  { %v189_v17 = vand.u32 4294901760, %v3486_v61  ;;  %v196_v19 = vand.u32 4294901760, %v3488_v62  ;;  %v203_v20 = vand.u32 4294901760, %v3490_v63  ;;  %v210_v21 = vand.u32 4294901760, %v3492_v0 }
  0x12   :  { %2985 = vmatpush3.bf16.msra.mxu0 %v3434_v30  ;;  %v217_v22 = vand.u32 4294901760, %v3494_v1  ;;  %v224_v24 = vand.u32 4294901760, %v3496_v3  ;;  %v231_v25 = vand.u32 4294901760, %v3500_v6  ;;  %v238_v26 = vand.u32 4294901760, %v3502_v7 }
  0x13   :  { %2986 = vmatprep.subr.bf16.mxu0 %v3334_v2  ;;  %v3520_v27 = vpack.c.bf16 %v140_v47, %v133_v46  ;;  %v3522_v28 = vpack.c.bf16 %v154_v53, %v147_v52  ;;  %v3525_v29 = vpack.c.bf16 %v168_v10, %v161_v59  ;;  %v3527_v31 = vpack.c.bf16 %v182_v16, %v175_v14 }
  0x14   :  { %v3529_v32 = vpack.c.bf16 %v196_v19, %v189_v17  ;;  %v3531_v36 = vpack.c.bf16 %v210_v21, %v203_v20  ;;  %v3534_v37 = vpack.c.bf16 %v224_v24, %v217_v22  ;;  %v3536_v38 = vpack.c.bf16 %v238_v26, %v231_v25 }
  0x15   :  { %v124_v39 = vand.u32 4294901760, %v123_v8  ;;  %v162_v40 = vsub.f32 %v3464_v48, %v161_v59  ;;  %v3540_v41 = vpack.c.bf16 %v142_v15, %v135_v9  ;;  %v149_v46 = vand.u32 4294901760, %v148_v4 }
  0x16   :  { %2988 = vmatpush3.bf16.msra.mxu0 %v3455_v44  ;;  %v156_v47 = vand.u32 4294901760, %v155_v5  ;;  %v169_v52 = vsub.f32 %v3474_v54, %v168_v10  ;;  %v176_v53 = vsub.f32 %v3480_v58, %v175_v14  ;;  %v183_v59 = vsub.f32 %v3484_v60, %v182_v16 }
  0x17   :  { %2989 = vmatprep.subr.bf16.mxu0 %v3334_v2  ;;  %v163_v57 = vand.u32 4294901760, %v162_v40  ;;  %v190_v10 = vsub.f32 %v3486_v61, %v189_v17  ;;  %v197_v14 = vsub.f32 %v3488_v62, %v196_v19  ;;  %v204_v15 = vsub.f32 %v3490_v63, %v203_v20 }
  0x18   :  { %v3546_v56 = vpack.c.bf16 %v156_v47, %v149_v46  ;;  %v170_v8 = vand.u32 4294901760, %v169_v52  ;;  %v177_v4 = vand.u32 4294901760, %v176_v53  ;;  %v184_v9 = vand.u32 4294901760, %v183_v59 }
  0x19   :  { %v198_v40 = vand.u32 4294901760, %v197_v14  ;;  %v211_v46 = vsub.f32 %v3492_v0, %v210_v21  ;;  %v218_v47 = vsub.f32 %v3494_v1, %v217_v22  ;;  %v205_v19 = vand.u32 4294901760, %v204_v15 }
  0x1a   :  { %2991 = vmatpush3.bf16.msra.mxu0 %v3466_v49  ;;  %v3553_v5 = vpack.c.bf16 %v170_v8, %v163_v57  ;;  %v3560_v16 = vpack.c.bf16 %v184_v9, %v177_v4  ;;  %v225_v20 = vsub.f32 %v3496_v3, %v224_v24  ;;  %v232_v8 = vsub.f32 %v3500_v6, %v231_v25 }
  0x1b   :  { %2992 = vmatprep.subr.bf16.mxu0 %v3334_v2  ;;  %v212_v52 = vand.u32 4294901760, %v211_v46  ;;  %v219_v53 = vand.u32 4294901760, %v218_v47  ;;  %v239_v22 = vsub.f32 %v3502_v7, %v238_v26  ;;  %v3587_v25 = vpack.c.bf16 %v3447_v35, %v3445_v34 }
  0x1c   :  { %v226_v21 = vand.u32 4294901760, %v225_v20  ;;  %v233_v4 = vand.u32 4294901760, %v232_v8  ;;  %v3594_v26 = vpack.c.bf16 %v3452_v43, %v3450_v42  ;;  %v3602_v34 = vpack.c.bf16 %v3474_v54, %v3464_v48 }
  0x1d   :  { %v3571_v57 = vpack.c.bf16 %v212_v52, %v205_v19  ;;  %v240_v24 = vand.u32 4294901760, %v239_v22  ;;  %v3608_v35 = vpack.c.bf16 %v3484_v60, %v3480_v58  ;;  %v3614_v42 = vpack.c.bf16 %v3488_v62, %v3486_v61 }
  0x1e   :  { %2994 = vmatpush3.bf16.msra.mxu0 %v3468_v50  ;;  %v3577_v59 = vpack.c.bf16 %v226_v21, %v219_v53  ;;  %v3620_v43 = vpack.c.bf16 %v3492_v0, %v3490_v63  ;;  %v3626_v48 = vpack.c.bf16 %v3496_v3, %v3494_v1  ;;  %v3632_v54 = vpack.c.bf16 %v3502_v7, %v3500_v6 }
  0x1f   :  { %2995 = vmatprep.subr.bf16.mxu0 %v3334_v2  ;;  %v3581_v9 = vpack.c.bf16 %v240_v24, %v233_v4 }
  0x22   :  { %2997 = vmatpush3.bf16.msra.mxu0 %v3470_v51 }
  0x23   :  { %2998 = vmatprep.subr.bf16.mxu0 %v3334_v2 }
  0x25   :  { %2527 = vmatmul.mubr.f32.vlgmr.msra.gmra.mrb[0].mxu0 %v124_v39  ;;  %v191_v39 = vand.u32 4294901760, %v190_v10 }
  0x26   :  { %3000 = vmatpush3.bf16.msra.mxu0 %v3540_v41  ;;  %2561 = vmatprep.mubr.msk.f32.mxu0 %vm3335_vm0, %v3336_v11 }
  0x27   :  { %3001 = vmatprep.subr.bf16.mxu0 %v3334_v2  ;;  %v3566_v17 = vpack.c.bf16 %v198_v40, %v191_v39 }
  0x2a   :  { %3003 = vmatpush3.bf16.msra.mxu0 %v3546_v56 }
  0x2b   :  { %3004 = vmatprep.subr.bf16.mxu0 %v3334_v2 }
  0x2e   :  { %3006 = vmatpush3.bf16.msra.mxu0 %v3553_v5 }
  0x2f   :  { %3007 = vmatprep.subr.bf16.mxu0 %v3334_v2 }
  0x32   :  { %3009 = vmatpush3.bf16.msra.mxu0 %v3560_v16 }
  0x33   :  { %3010 = vmatprep.subr.bf16.mxu0 %v3334_v2 }
  0x36   :  { %3012 = vmatpush3.bf16.msra.mxu0 %v3566_v17 }
  0x37   :  { %3013 = vmatprep.subr.bf16.mxu0 %v3334_v2 }
  0x3a   :  { %3015 = vmatpush3.bf16.msra.mxu0 %v3571_v57 }
  0x3b   :  { %3016 = vmatprep.subr.bf16.mxu0 %v3334_v2 }
  0x3e   :  { %3018 = vmatpush3.bf16.msra.mxu0 %v3577_v59 }
  0x3f   :  { %3019 = vmatprep.subr.bf16.mxu0 %v3334_v2 }
  0x42   :  { %3021 = vmatpush3.bf16.msra.mxu0 %v3581_v9 }
  0x43   :  { %3022 = vmatprep.subr.bf16.mxu0 %v3334_v2 }
  0x45   :  { %2562 = vmatmul.mubr.f32.vlgmr.msra.gmra.mrb[0].mxu0 %v3443_v33 }
  0x46   :  { %3024 = vmatpush3.bf16.msra.mxu0 %v3587_v25  ;;  %2596 = vmatprep.mubr.msk.f32.mxu0 %vm3335_vm0, %v3336_v11 }
  0x47   :  { %3025 = vmatprep.subr.bf16.mxu0 %v3334_v2 }
  0x4a   :  { %3027 = vmatpush3.bf16.msra.mxu0 %v3594_v26 }
  0x4b   :  { %3028 = vmatprep.subr.bf16.mxu0 %v3334_v2 }
  0x4e   :  { %3030 = vmatpush3.bf16.msra.mxu0 %v3602_v34 }
  0x4f   :  { %3031 = vmatprep.subr.bf16.mxu0 %v3334_v2 }
  0x52   :  { %3033 = vmatpush3.bf16.msra.mxu0 %v3608_v35 }
  0x53   :  { %3034 = vmatprep.subr.bf16.mxu0 %v3334_v2 }
  0x56   :  { %3036 = vmatpush3.bf16.msra.mxu0 %v3614_v42 }
  0x57   :  { %3037 = vmatprep.subr.bf16.mxu0 %v3334_v2 }
  0x5a   :  { %3039 = vmatpush3.bf16.msra.mxu0 %v3620_v43 }
  0x5b   :  { %3040 = vmatprep.subr.bf16.mxu0 %v3334_v2 }
  0x5e   :  { %3042 = vmatpush3.bf16.msra.mxu0 %v3626_v48 }
  0x5f   :  { %3043 = vmatprep.subr.bf16.mxu0 %v3334_v2 }
  0x62   :  { %3045 = vmatpush3.bf16.msra.mxu0 %v3632_v54 }
  0x63   :  { %3046 = vmatprep.subr.bf16.mxu0 %v3334_v2 }
  0x65   :  { %2597 = vmatmul.mubr.f32.vlgmr.msra.gmra.mrb[0].mxu0 %v3459_v45  ;;  %v38_v45 = vld [vmem:[%s3899_s4] sm:$0xf] }
  0x66   :  { %3048 = vmatpush3.bf16.msra.mxu0 %v3392_v12  ;;  %2631 = vmatprep.mubr.msk.f32.mxu0 %vm3335_vm0, %v3336_v11 }
  0x67   :  { %3049 = vmatprep.subr.bf16.mxu0 %v3334_v2 }
  0x6a   :  { %3051 = vmatpush3.bf16.msra.mxu0 %v3397_v13 }
  0x6b   :  { %3052 = vmatprep.subr.bf16.mxu0 %v3334_v2 }
  0x6e   :  { %3054 = vmatpush3.bf16.msra.mxu0 %v3407_v18 }
  0x6f   :  { %3055 = vmatprep.subr.bf16.mxu0 %v3334_v2 }
  0x72   :  { %3057 = vmatpush3.bf16.msra.mxu0 %v3434_v30 }
  0x73   :  { %3058 = vmatprep.subr.bf16.mxu0 %v3334_v2 }
  0x76   :  { %3060 = vmatpush3.bf16.msra.mxu0 %v3455_v44 }
  0x77   :  { %3061 = vmatprep.subr.bf16.mxu0 %v3334_v2 }
  0x7a   :  { %3063 = vmatpush3.bf16.msra.mxu0 %v3466_v49 }
  0x7b   :  { %3064 = vmatprep.subr.bf16.mxu0 %v3334_v2 }
  0x7e   :  { %3066 = vmatpush3.bf16.msra.mxu0 %v3468_v50 }
  0x7f   :  { %3067 = vmatprep.subr.bf16.mxu0 %v3334_v2 }
  0x82   :  { %3069 = vmatpush3.bf16.msra.mxu0 %v3470_v51 }
  0x83   :  { %3070 = vmatprep.subr.bf16.mxu0 %v3334_v2 }
  0x85   :  { %2632 = vmatmul.mubr.f32.vlgmr.msra.gmra.mrb[0].mxu0 %v122_v55  ;;  %v687_v55 = vsel %vm685_vm1, %v38_v45, 0 }
  0x86   :  { %3072 = vmatpush3.bf16.msra.mxu0 %v3520_v27  ;;  %2666 = vmatprep.mubr.msk.f32.mxu0 %vm3335_vm0, %v3336_v11  ;;  %v3701_v58 = vand.u32 4294901760, %v687_v55 }
  0x87   :  { %3073 = vmatprep.subr.bf16.mxu0 %v3334_v2 }
  0x88   :  { %2705 = vmatpush3.msra.mxu1 %v3701_v58 }
  0x89   :  { %2709 = vmatprep.subr.mxu1 %v3336_v11 }
  0x8a   :  { %3075 = vmatpush3.bf16.msra.mxu0 %v3522_v28 }
  0x8b   :  { %3076 = vmatprep.subr.bf16.mxu0 %v3334_v2 }
  0x8e   :  { %3078 = vmatpush3.bf16.msra.mxu0 %v3525_v29 }
  0x8f   :  { %3079 = vmatprep.subr.bf16.mxu0 %v3334_v2 }
  0x92   :  { %3081 = vmatpush3.bf16.msra.mxu0 %v3527_v31 }
  0x93   :  { %3082 = vmatprep.subr.bf16.mxu0 %v3334_v2 }
  0x96   :  { %3084 = vmatpush3.bf16.msra.mxu0 %v3529_v32 }
  0x97   :  { %3085 = vmatprep.subr.bf16.mxu0 %v3334_v2 }
  0x9a   :  { %3087 = vmatpush3.bf16.msra.mxu0 %v3531_v36 }
  0x9b   :  { %3088 = vmatprep.subr.bf16.mxu0 %v3334_v2 }
  0x9e   :  { %3090 = vmatpush3.bf16.msra.mxu0 %v3534_v37 }
  0x9f   :  { %3091 = vmatprep.subr.bf16.mxu0 %v3334_v2 }
  0xa2   :  { %3093 = vmatpush3.bf16.msra.mxu0 %v3536_v38 }
  0xa3   :  { %3094 = vmatprep.subr.bf16.mxu0 %v3334_v2 }
  0xa5   :  { %2667 = vmatmul.mubr.f32.vlgmr.msra.gmra.mrb[0].mxu0 %v3443_v33 }
  0xa6   :  { %3096 = vmatpush3.bf16.msra.mxu0 %v3392_v12  ;;  %2701 = vmatprep.mubr.msk.f32.mxu0 %vm3335_vm0, %v3336_v11 }
  0xa7   :  { %3097 = vmatprep.subr.bf16.mxu0 %v3334_v2 }
  0xaa   :  { %3099 = vmatpush3.bf16.msra.mxu0 %v3397_v13 }
  0xab   :  { %3100 = vmatprep.subr.bf16.mxu0 %v3334_v2 }
  0xae   :  { %3102 = vmatpush3.bf16.msra.mxu0 %v3407_v18 }
  0xaf   :  { %3103 = vmatprep.subr.bf16.mxu0 %v3334_v2 }
  0xb2   :  { %3105 = vmatpush3.bf16.msra.mxu0 %v3434_v30 }
  0xb3   :  { %3106 = vmatprep.subr.bf16.mxu0 %v3334_v2 }
  0xb6   :  { %3108 = vmatpush3.bf16.msra.mxu0 %v3455_v44 }
  0xb7   :  { %3109 = vmatprep.subr.bf16.mxu0 %v3334_v2 }
  0xba   :  { %3111 = vmatpush3.bf16.msra.mxu0 %v3466_v49 }
  0xbb   :  { %3112 = vmatprep.subr.bf16.mxu0 %v3334_v2 }
  0xbe   :  { %3114 = vmatpush3.bf16.msra.mxu0 %v3468_v50 }
  0xbf   :  { %3115 = vmatprep.subr.bf16.mxu0 %v3334_v2 }
  0xc2   :  { %3117 = vmatpush3.bf16.msra.mxu0 %v3470_v51 }
  0xc3   :  { %2944 = vmatprep.subr.mxu0 %v3336_v11 }
  0xc5   :  { %2702 = vmatmul.mubr.f32.vlgmr.msra.gmra.mrb[0].mxu0 %v3443_v33  ;;  %v3708_v33 = vsub.f32 %v687_v55, %v3701_v58 }
  0xc6   :  { %2946 = vmatprep.mubr.msk.f32.mxu0 %vm3335_vm0, %v3336_v11  ;;  %2945 = vmatpush3.msra.mxu0 %v3701_v58 }
  0xc7   :  { %2949 = vmatprep.subr.mxu0 %v3336_v11  ;;  %v3712_v0 = vand.u32 4294901760, %v3708_v33 }
  0xc9   :  { %v769_v6 = vsub.f32 %v3708_v33, %v3712_v0 }
  0xcb   :  { %v3716_v14 = vand.u32 4294901760, %v769_v6 }
 0x198   :  { %v676_v60 = vpop.f32.mrb[0].mxu0 }
 0x199   :  { %v680_v61 = vmul.f32 0.03125, %v676_v60  ;;  %v2703_v62 = vpop.f32.mrb[1].mxu0 }
 0x19b   :  { %v683_v63 = vsel %vm681_vm2, %v680_v61, 0 }
 0x19c   :  { %v755_v1 = vand.u32 4294901760, %v683_v63 }
 0x19e   :  { %v756_v3 = vsub.f32 %v683_v63, %v755_v1 }
 0x1a0   :  { %v757_v7 = vand.u32 4294901760, %v756_v3 }
 0x1a2   :  { %v758_v10 = vsub.f32 %v756_v3, %v757_v7 }
 0x1a4   :  { %v759_v15 = vand.u32 4294901760, %v758_v10 }
 0x1a6   :  { %2707 = vmatmul.mubr.f32.vlgmr.msra.gmra.mrb[0].mxu1 %v759_v15 }
 0x1a7   :  { %2710 = vmatpush3.msra.mxu1 %v3716_v14  ;;  %2711 = vmatprep.mubr.msk.f32.mxu1 %vm3335_vm0, %v3336_v11 }
 0x1a8   :  { %2714 = vmatprep.subr.mxu1 %v3336_v11 }
 0x1ae   :  { %2712 = vmatmul.mubr.f32.vlgmr.msra.gmra.mrb[0].mxu1 %v755_v1 }
 0x1af   :  { %2715 = vmatpush3.msra.mxu1 %v3708_v33  ;;  %2716 = vmatprep.mubr.msk.f32.mxu1 %vm3335_vm0, %v3336_v11 }
 0x1b0   :  { %2719 = vmatprep.subr.mxu1 %v3336_v11 }
 0x1b6   :  { %2717 = vmatmul.mubr.f32.vlgmr.msra.gmra.mrb[0].mxu1 %v756_v3 }
 0x1b7   :  { %2720 = vmatpush3.msra.mxu1 %v3701_v58  ;;  %2721 = vmatprep.mubr.msk.f32.mxu1 %vm3335_vm0, %v3336_v11 }
 0x1b8   :  { %2724 = vmatprep.subr.mxu1 %v3336_v11 }
 0x1be   :  { %2722 = vmatmul.mubr.f32.vlgmr.msra.gmra.mrb[0].mxu1 %v757_v7 }
 0x1bf   :  { %2725 = vmatpush3.msra.mxu1 %v3712_v0  ;;  %2726 = vmatprep.mubr.msk.f32.mxu1 %vm3335_vm0, %v3336_v11 }
 0x1c0   :  { %2729 = vmatprep.subr.mxu1 %v3336_v11 }
 0x1c6   :  { %2727 = vmatmul.mubr.f32.vlgmr.msra.gmra.mrb[0].mxu1 %v755_v1 }
 0x1c7   :  { %2730 = vmatpush3.msra.mxu1 %v3701_v58  ;;  %2731 = vmatprep.mubr.msk.f32.mxu1 %vm3335_vm0, %v3336_v11 }
 0x1c8   :  { %3118 = vmatprep.subr.bf16.mxu1 %v3334_v2 }
 0x1ce   :  { %2732 = vmatmul.mubr.f32.vlgmr.msra.gmra.mrb[0].mxu1 %v755_v1 }
 0x1cf   :  { %3120 = vmatpush3.bf16.msra.mxu1 %v3392_v12  ;;  %2766 = vmatprep.mubr.msk.f32.mxu1 %vm3335_vm0, %v3336_v11 }
 0x1d0   :  { %3121 = vmatprep.subr.bf16.mxu1 %v3334_v2 }
 0x1d3   :  { %3123 = vmatpush3.bf16.msra.mxu1 %v3397_v13 }
 0x1d4   :  { %3124 = vmatprep.subr.bf16.mxu1 %v3334_v2 }
 0x1d7   :  { %3126 = vmatpush3.bf16.msra.mxu1 %v3407_v18 }
 0x1d8   :  { %3127 = vmatprep.subr.bf16.mxu1 %v3334_v2 }
 0x1db   :  { %3129 = vmatpush3.bf16.msra.mxu1 %v3434_v30 }
 0x1dc   :  { %3130 = vmatprep.subr.bf16.mxu1 %v3334_v2 }
 0x1df   :  { %3132 = vmatpush3.bf16.msra.mxu1 %v3455_v44 }
 0x1e0   :  { %3133 = vmatprep.subr.bf16.mxu1 %v3334_v2 }
 0x1e3   :  { %3135 = vmatpush3.bf16.msra.mxu1 %v3466_v49 }
 0x1e4   :  { %3136 = vmatprep.subr.bf16.mxu1 %v3334_v2 }
 0x1e7   :  { %3138 = vmatpush3.bf16.msra.mxu1 %v3468_v50 }
 0x1e8   :  { %3139 = vmatprep.subr.bf16.mxu1 %v3334_v2 }
 0x1eb   :  { %3141 = vmatpush3.bf16.msra.mxu1 %v3470_v51 }
 0x1ec   :  { %3142 = vmatprep.subr.bf16.mxu1 %v3334_v2 }
 0x2a1   :  { %v1131_v39 = vpop.f32.mrb[0].mxu1 }
 0x2a2   :  { %v3757_v40 = vsub.f32 %v3419_v23, %v1131_v39  ;;  %v2733_v46 = vpop.f32.mrb[1].mxu1 }
 0x2a4   :  { %v1136_v47 = vmul.f32 %v3757_v40, %v3757_v40 }
 0x2a6   :  { %v3761_v19 = vand.u32 4294901760, %v1136_v47 }
 0x2a8   :  { %v1219_v52 = vsub.f32 %v1136_v47, %v3761_v19 }
 0x2aa   :  { %v1220_v20 = vand.u32 4294901760, %v1219_v52 }
 0x2ac   :  { %v1221_v53 = vsub.f32 %v1219_v52, %v1220_v20 }
 0x2ae   :  { %v1222_v21 = vand.u32 4294901760, %v1221_v53 }
 0x2b0   :  { %2767 = vmatmul.mubr.f32.vlgmr.msra.gmra.mrb[2].mxu1 %v1222_v21 }
 0x2b1   :  { %3144 = vmatpush3.bf16.msra.mxu1 %v3540_v41  ;;  %2801 = vmatprep.mubr.msk.f32.mxu1 %vm3335_vm0, %v3336_v11 }
 0x2b2   :  { %3145 = vmatprep.subr.bf16.mxu1 %v3334_v2 }
 0x2b5   :  { %3147 = vmatpush3.bf16.msra.mxu1 %v3546_v56 }
 0x2b6   :  { %3148 = vmatprep.subr.bf16.mxu1 %v3334_v2 }
 0x2b9   :  { %3150 = vmatpush3.bf16.msra.mxu1 %v3553_v5 }
 0x2ba   :  { %3151 = vmatprep.subr.bf16.mxu1 %v3334_v2 }
 0x2bd   :  { %3153 = vmatpush3.bf16.msra.mxu1 %v3560_v16 }
 0x2be   :  { %3154 = vmatprep.subr.bf16.mxu1 %v3334_v2 }
 0x2c1   :  { %3156 = vmatpush3.bf16.msra.mxu1 %v3566_v17 }
 0x2c2   :  { %3157 = vmatprep.subr.bf16.mxu1 %v3334_v2 }
 0x2c5   :  { %3159 = vmatpush3.bf16.msra.mxu1 %v3571_v57 }
 0x2c6   :  { %3160 = vmatprep.subr.bf16.mxu1 %v3334_v2 }
 0x2c9   :  { %3162 = vmatpush3.bf16.msra.mxu1 %v3577_v59 }
 0x2ca   :  { %3163 = vmatprep.subr.bf16.mxu1 %v3334_v2 }
 0x2cd   :  { %3165 = vmatpush3.bf16.msra.mxu1 %v3581_v9 }
 0x2ce   :  { %3166 = vmatprep.subr.bf16.mxu1 %v3334_v2 }
 0x2d0   :  { %2802 = vmatmul.mubr.f32.vlgmr.msra.gmra.mrb[2].mxu1 %v3761_v19 }
 0x2d1   :  { %3168 = vmatpush3.bf16.msra.mxu1 %v3587_v25  ;;  %2836 = vmatprep.mubr.msk.f32.mxu1 %vm3335_vm0, %v3336_v11 }
 0x2d2   :  { %3169 = vmatprep.subr.bf16.mxu1 %v3334_v2 }
 0x2d5   :  { %3171 = vmatpush3.bf16.msra.mxu1 %v3594_v26 }
 0x2d6   :  { %3172 = vmatprep.subr.bf16.mxu1 %v3334_v2 }
 0x2d9   :  { %3174 = vmatpush3.bf16.msra.mxu1 %v3602_v34 }
 0x2da   :  { %3175 = vmatprep.subr.bf16.mxu1 %v3334_v2 }
 0x2dd   :  { %3177 = vmatpush3.bf16.msra.mxu1 %v3608_v35 }
 0x2de   :  { %3178 = vmatprep.subr.bf16.mxu1 %v3334_v2 }
 0x2e1   :  { %3180 = vmatpush3.bf16.msra.mxu1 %v3614_v42 }
 0x2e2   :  { %3181 = vmatprep.subr.bf16.mxu1 %v3334_v2 }
 0x2e5   :  { %3183 = vmatpush3.bf16.msra.mxu1 %v3620_v43 }
 0x2e6   :  { %3184 = vmatprep.subr.bf16.mxu1 %v3334_v2 }
 0x2e9   :  { %3186 = vmatpush3.bf16.msra.mxu1 %v3626_v48 }
 0x2ea   :  { %3187 = vmatprep.subr.bf16.mxu1 %v3334_v2 }
 0x2ed   :  { %3189 = vmatpush3.bf16.msra.mxu1 %v3632_v54 }
 0x2ee   :  { %3190 = vmatprep.subr.bf16.mxu1 %v3334_v2 }
 0x2f0   :  { %2837 = vmatmul.mubr.f32.vlgmr.msra.gmra.mrb[2].mxu1 %v1219_v52 }
 0x2f1   :  { %3192 = vmatpush3.bf16.msra.mxu1 %v3392_v12  ;;  %2871 = vmatprep.mubr.msk.f32.mxu1 %vm3335_vm0, %v3336_v11 }
 0x2f2   :  { %3193 = vmatprep.subr.bf16.mxu1 %v3334_v2 }
 0x2f5   :  { %3195 = vmatpush3.bf16.msra.mxu1 %v3397_v13 }
 0x2f6   :  { %3196 = vmatprep.subr.bf16.mxu1 %v3334_v2 }
 0x2f9   :  { %3198 = vmatpush3.bf16.msra.mxu1 %v3407_v18 }
 0x2fa   :  { %3199 = vmatprep.subr.bf16.mxu1 %v3334_v2 }
 0x2fd   :  { %3201 = vmatpush3.bf16.msra.mxu1 %v3434_v30 }
 0x2fe   :  { %3202 = vmatprep.subr.bf16.mxu1 %v3334_v2 }
 0x301   :  { %3204 = vmatpush3.bf16.msra.mxu1 %v3455_v44 }
 0x302   :  { %3205 = vmatprep.subr.bf16.mxu1 %v3334_v2 }
 0x305   :  { %3207 = vmatpush3.bf16.msra.mxu1 %v3466_v49 }
 0x306   :  { %3208 = vmatprep.subr.bf16.mxu1 %v3334_v2 }
 0x309   :  { %3210 = vmatpush3.bf16.msra.mxu1 %v3468_v50 }
 0x30a   :  { %3211 = vmatprep.subr.bf16.mxu1 %v3334_v2 }
 0x30d   :  { %3213 = vmatpush3.bf16.msra.mxu1 %v3470_v51 }
 0x30e   :  { %3214 = vmatprep.subr.bf16.mxu1 %v3334_v2 }
 0x310   :  { %2872 = vmatmul.mubr.f32.vlgmr.msra.gmra.mrb[2].mxu1 %v1220_v20 }
 0x311   :  { %3216 = vmatpush3.bf16.msra.mxu1 %v3520_v27  ;;  %2906 = vmatprep.mubr.msk.f32.mxu1 %vm3335_vm0, %v3336_v11 }
 0x312   :  { %3217 = vmatprep.subr.bf16.mxu1 %v3334_v2 }
 0x315   :  { %3219 = vmatpush3.bf16.msra.mxu1 %v3522_v28 }
 0x316   :  { %3220 = vmatprep.subr.bf16.mxu1 %v3334_v2 }
 0x319   :  { %3222 = vmatpush3.bf16.msra.mxu1 %v3525_v29 }
 0x31a   :  { %3223 = vmatprep.subr.bf16.mxu1 %v3334_v2 }
 0x31d   :  { %3225 = vmatpush3.bf16.msra.mxu1 %v3527_v31 }
 0x31e   :  { %3226 = vmatprep.subr.bf16.mxu1 %v3334_v2 }
 0x321   :  { %3228 = vmatpush3.bf16.msra.mxu1 %v3529_v32 }
 0x322   :  { %3229 = vmatprep.subr.bf16.mxu1 %v3334_v2 }
 0x325   :  { %3231 = vmatpush3.bf16.msra.mxu1 %v3531_v36  ;;  %v2265_v36 = vld [vmem:[%s3897_s2] ss:$0 sm:$0xff] }
 0x326   :  { %3232 = vmatprep.subr.bf16.mxu1 %v3334_v2 }
 0x329   :  { %3234 = vmatpush3.bf16.msra.mxu1 %v3534_v37 }
 0x32a   :  { %3235 = vmatprep.subr.bf16.mxu1 %v3334_v2 }
 0x32d   :  { %3237 = vmatpush3.bf16.msra.mxu1 %v3536_v38 }
 0x32e   :  { %3238 = vmatprep.subr.bf16.mxu1 %v3334_v2 }
 0x330   :  { %2907 = vmatmul.mubr.f32.vlgmr.msra.gmra.mrb[2].mxu1 %v3761_v19 }
 0x331   :  { %3240 = vmatpush3.bf16.msra.mxu1 %v3392_v12  ;;  %2941 = vmatprep.mubr.msk.f32.mxu1 %vm3335_vm0, %v3336_v11 }
 0x332   :  { %3241 = vmatprep.subr.bf16.mxu1 %v3334_v2 }
 0x335   :  { %3243 = vmatpush3.bf16.msra.mxu1 %v3397_v13 }
 0x336   :  { %3244 = vmatprep.subr.bf16.mxu1 %v3334_v2 }
 0x339   :  { %3246 = vmatpush3.bf16.msra.mxu1 %v3407_v18 }
 0x33a   :  { %3247 = vmatprep.subr.bf16.mxu1 %v3334_v2 }
 0x33d   :  { %3249 = vmatpush3.bf16.msra.mxu1 %v3434_v30 }
 0x33e   :  { %3250 = vmatprep.subr.bf16.mxu1 %v3334_v2 }
 0x341   :  { %3252 = vmatpush3.bf16.msra.mxu1 %v3455_v44 }
 0x342   :  { %3253 = vmatprep.subr.bf16.mxu1 %v3334_v2 }
 0x345   :  { %3255 = vmatpush3.bf16.msra.mxu1 %v3466_v49 }
 0x346   :  { %3256 = vmatprep.subr.bf16.mxu1 %v3334_v2 }
 0x349   :  { %3258 = vmatpush3.bf16.msra.mxu1 %v3468_v50  ;;  %v2264_v50 = vld [vmem:[%s3896_s1] ss:$0 sm:$0xff] }
 0x34a   :  { %3259 = vmatprep.subr.bf16.mxu1 %v3334_v2 }
 0x34d   :  { %3261 = vmatpush3.bf16.msra.mxu1 %v3470_v51 }
 0x350   :  { %2942 = vmatmul.mubr.f32.vlgmr.msra.gmra.mrb[2].mxu1 %v3761_v19 }
 0x423   :  { %v1774_v12 = vpop.f32.mrb[2].mxu1 }
 0x424   :  { %v1778_v13 = vmul.f32 0.03125, %v1774_v12  ;;  %v2943_v18 = vpop.f32.mrb[3].mxu1 }
 0x426   :  { %v1779_v23 = vadd.f32 1e-05, %v1778_v13 }
 0x428   :  { %3308 = vrsqrt.f32 %v1779_v23 }
 0x432   :  { %v3309_v30 = vpop.eup %3308 }
 0x433   :  { %v1782_v44 = vsel %vm681_vm2, %v3309_v30, 0 }
 0x434   :  { %v1850_v27 = vand.u32 4294901760, %v1782_v44 }
 0x436   :  { %v1851_v49 = vsub.f32 %v1782_v44, %v1850_v27 }
 0x438   :  { %v1852_v28 = vand.u32 4294901760, %v1851_v49 }
 0x43a   :  { %v1853_v29 = vsub.f32 %v1851_v49, %v1852_v28 }
 0x43c   :  { %v1854_v31 = vand.u32 4294901760, %v1853_v29 }
 0x43e   :  { %2947 = vmatmul.mubr.f32.vlgmr.msra.gmra.mrb[2].mxu0 %v1854_v31 }
 0x43f   :  { %2950 = vmatpush3.msra.mxu0 %v3716_v14  ;;  %2951 = vmatprep.mubr.msk.f32.mxu0 %vm3335_vm0, %v3336_v11 }
 0x440   :  { %2954 = vmatprep.subr.mxu0 %v3336_v11 }
 0x446   :  { %2952 = vmatmul.mubr.f32.vlgmr.msra.gmra.mrb[2].mxu0 %v1850_v27 }
 0x447   :  { %2955 = vmatpush3.msra.mxu0 %v3708_v33  ;;  %2956 = vmatprep.mubr.msk.f32.mxu0 %vm3335_vm0, %v3336_v11 }
 0x448   :  { %2959 = vmatprep.subr.mxu0 %v3336_v11 }
 0x44e   :  { %2957 = vmatmul.mubr.f32.vlgmr.msra.gmra.mrb[2].mxu0 %v1851_v49 }
 0x44f   :  { %2960 = vmatpush3.msra.mxu0 %v3701_v58  ;;  %2961 = vmatprep.mubr.msk.f32.mxu0 %vm3335_vm0, %v3336_v11 }
 0x450   :  { %2964 = vmatprep.subr.mxu0 %v3336_v11 }
 0x456   :  { %2962 = vmatmul.mubr.f32.vlgmr.msra.gmra.mrb[2].mxu0 %v1852_v28 }
 0x457   :  { %2965 = vmatpush3.msra.mxu0 %v3712_v0  ;;  %2966 = vmatprep.mubr.msk.f32.mxu0 %vm3335_vm0, %v3336_v11 }
 0x458   :  { %2969 = vmatprep.subr.mxu0 %v3336_v11 }
 0x45e   :  { %2967 = vmatmul.mubr.f32.vlgmr.msra.gmra.mrb[2].mxu0 %v1850_v27 }
 0x45f   :  { %2970 = vmatpush3.msra.mxu0 %v3701_v58  ;;  %2971 = vmatprep.mubr.msk.f32.mxu0 %vm3335_vm0, %v3336_v11 }
 0x466   :  { %2972 = vmatmul.mubr.f32.vlgmr.msra.gmra.mrb[2].mxu0 %v1850_v27 }
 0x539   :  { %v2226_v2 = vpop.f32.mrb[2].mxu0 }
 0x53a   :  { %v2230_v51 = vmul.f32 %v2226_v2, %v3757_v40  ;;  %v2973_v32 = vpop.f32.mrb[3].mxu0 }
 0x53c   :  { %v2238_v37 = vmul.f32 %v2264_v50, %v2230_v51 }
 0x53e   :  { %v2246_v38 = vadd.f32 %v2265_v36, %v2238_v37 }
 0x540   :  { %2247 = vst [vmem:[#allocation2] sm:$0xff] %v2246_v38 }
 0x541   :  { %2252 = vsyncadd [#allocation3], 64  ;;  %s3337_s30 = smov [#allocation2]  }
 0x542   :  { %s2253_s6 = sshll.u32 %s3337_s30, 4  ;;  %s2254_s6 = int_to_ptr.vmem [resolvable:$true] %s2253_s6 }
 0x543   :  { %s3310_s7 = scalar_lea.vmem %s2254_s6, 64  ;;  %s3314_s8 = scalar_lea.vmem %s2254_s6, 128 }
 0x544   :  { %p3311_p0 = scmp.ne.s32.totalorder %s2254_s6, %s3310_s7  ;;  %p3315_p1 = scmp.lt.s32.totalorder %s2254_s6, %s2254_s6 }
 0x545   :  { %p3316_p2 = scmp.lt.s32.totalorder %s3314_s8, %s3310_s7 }
 0x547   :  { %p3317_p3 = por %p3316_p2, %p3315_p1 }
 0x549   :  { %p3318_p4 = pnand %p3317_p3, %p3311_p0 }
 0x54b   :  { %3321 = shalt.err (!%p3318_p4)
}
 0x54c   :  { %s3322_s10 = scalar_lea.hbm %s3900_s5, 64 }
 0x54d   :  { %p3323_p5 = scmp.ne.s32.totalorder %s3900_s5, %s3322_s10  ;;  %p3326_p6 = scmp.lt.u32.totalorder %s3322_s10, %s3900_s5 }
 0x54f   :  { %p3328_p7 = pnand %p3326_p6, %p3323_p5 }
 0x551   :  { %3331 = shalt.err (!%p3328_p7)
}
 0x552   :  { %s3338_s14 = smov 64   ;;  %s3339_s15 = smov 4  }
 0x553   :  { %2259 = dma.vmem_to_hbm [thread:$0]  %s2254_s6, 64, %s3900_s5, [#allocation3], %s3338_s14, %s3338_s14, %s3339_s15  }
 0x554   :  { %3332 = dma.done.wait [#allocation3], 128  }
 0x555   :  { %3333 = vsyncadd [#allocation3], 4294967168 }
 0x556   :  { %2263 = vsyncpa [#allocation3], 1 }

</bundles_post_ra>
